<compile_context>
chip_gen: v7x
topology: tpu7x:2x2x1
jax: 0.10.0
libtpu: 0.0.40
codegen_flags: <defaults>
</compile_context>

<pallas_src>
import jax
import jax.numpy as jnp
from jax.experimental import pallas as pl
from jax.experimental.pallas import tpu as pltpu


def _round_up(x, m):
    return ((x + m - 1) // m) * m


def _choose_tm(m_out, k):
    # Keep the in-VMEM (TM, K) bf16 patch around <= 4 MiB so even K = 9*2048
    # fits; TM is a multiple of 8 (unmasked sublane stores, full MXU passes)
    # and capped at 512.
    cap = (4 * 1024 * 1024) // max(1, 2 * k)
    cap = max(8, min(512, (cap // 8) * 8))
    if m_out <= cap:
        return _round_up(max(m_out, 8), 8)
    return cap


def conv3x3_s2_p1_nhwc(x_nhwc, weight_oihw, bias):
    """nn.Conv2d(Cin, Cout, 3, stride=2, padding=1) on NHWC input -> NHWC output."""
    n, h, w, cin = x_nhwc.shape
    cout = weight_oihw.shape[0]
    ho = (h - 1) // 2 + 1            # = floor((h + 2 - 3)/2) + 1
    wo = (w - 1) // 2 + 1
    k = 9 * cin

    # ---- wrapper-side layout prep: ONE fused XLA copy, ~1.0x the padded input
    # zero-pad by 1 (conv padding) and round the padded extent up to even so the
    # 2x2 space-to-depth below is exact.
    hp = _round_up(h + 2, 2)
    wp = _round_up(w + 2, 2)
    xp = jnp.pad(x_nhwc, ((0, 0), (1, hp - h - 1), (1, wp - w - 1), (0, 0)))
    hs, ws = hp // 2, wp // 2        # hs = ho + 1, ws = wo + 1
    # space-to-depth: y[n, a*ws + b, (2*pr + pc)*cin + c] = xp[n, 2a+pr, 2b+pc, c]
    y = xp.reshape(n, hs, 2, ws, 2, cin).transpose(0, 1, 3, 2, 4, 5)
    y = y.reshape(n, hs * ws, 4 * cin).astype(jnp.bfloat16)

    # ---- tiling of the flattened output M = ho*ws (wo valid cols + 1 junk col)
    m_out = ho * ws
    tm = _choose_tm(m_out, k)
    m_pad = _round_up(m_out, tm)
    halo = _round_up(ws + 1, 8)      # largest tap row-shift is ws + 1
    m_in = m_pad + halo
    y = jnp.pad(y, ((0, 0), (0, m_in - hs * ws), (0, 0)))  # zero rows only
    n_tiles = m_pad // tm
    slab = tm + halo

    # conv weights -> (kh, kw, cin, cout) -> (9*cin, cout); matches tap order.
    w_flat = jnp.transpose(weight_oihw, (2, 3, 1, 0)).reshape(k, cout)
    w_flat = w_flat.astype(jnp.bfloat16)
    b2 = bias.reshape(1, cout).astype(jnp.float32)

    tap_offs = tuple((kh // 2) * ws + (kw // 2) for kh in range(3) for kw in range(3))
    tap_grps = tuple(2 * (kh % 2) + (kw % 2) for kh in range(3) for kw in range(3))

    def kernel(y_ref, w_ref, b_ref, o_ref):
        # y_ref: (1, m_in, 4*cin) bf16 -- whole image, resident across M tiles.
        # w_ref: (9*cin, cout) bf16;  b_ref: (1, cout) f32
        # o_ref: (1, tm, cout) f32 flat output tile (junk cols sliced off outside)
        if n_tiles > 1:
            base = pl.multiple_of(pl.program_id(1) * tm, tm)
        else:
            base = 0
        win = y_ref[0, pl.ds(base, slab), :]                 # (slab, 4*cin)
        taps = [win[off:off + tm, g * cin:(g + 1) * cin]     # contiguous slices
                for off, g in zip(tap_offs, tap_grps)]
        patch = jnp.concatenate(taps, axis=-1)               # (tm, 9*cin) bf16
        acc = jnp.dot(patch, w_ref[...], preferred_element_type=jnp.float32)
        o_ref[0] = acc + b_ref[...]

    # Right-sized VMEM limit from the actual footprint (review item #7).
    est = (2 * m_in * 4 * cin * 2         # input block, double buffered
           + 2 * k * cout * 2             # weights
           + 2 * cout * 4                 # bias
           + 2 * tm * cout * 4            # output tile, double buffered
           + slab * 4 * cin * 2 + tm * k * 2 + tm * cout * 4)  # in-kernel values
    vmem_limit = int(min(100 * 1024 * 1024, max(16 * 1024 * 1024, 2 * est)))

    out_flat = pl.pallas_call(
        kernel,
        out_shape=jax.ShapeDtypeStruct((n, m_pad, cout), jnp.float32),
        grid_spec=pltpu.PrefetchScalarGridSpec(
            num_scalar_prefetch=0,
            grid=(n, n_tiles),
            in_specs=[
                pl.BlockSpec((1, m_in, 4 * cin), lambda i, j: (i, 0, 0)),
                pl.BlockSpec((k, cout), lambda i, j: (0, 0)),
                pl.BlockSpec((1, cout), lambda i, j: (0, 0)),
            ],
            out_specs=pl.BlockSpec((1, tm, cout), lambda i, j: (i, j, 0)),
        ),
        compiler_params=pltpu.CompilerParams(
            dimension_semantics=("parallel", "arbitrary"),
            vmem_limit_bytes=vmem_limit,
        ),
    )(y, w_flat, b2)

    # Strip the per-row junk column and the M padding (cheap: p6/p7 are small).
    out = out_flat[:, :m_out, :].reshape(n, ho, ws, cout)[:, :, :wo, :]
    return out


@jax.jit
def _last_level_p6p7_forward(p6_w, p6_b, p7_w, p7_b, x):
    # One NCHW->NHWC transpose at the boundary; the conv prep (pad +
    # space-to-depth + bf16 cast) fuses with it under jit.
    x_nhwc = jnp.transpose(x, (0, 2, 3, 1))
    p6_nhwc = conv3x3_s2_p1_nhwc(x_nhwc, p6_w, p6_b)
    # F.relu(p6): applied once; the bf16 cast + re-layout feeding p7's kernel is
    # one fused XLA copy over the small p6 map (no 2.25x round trip).
    p7_nhwc = conv3x3_s2_p1_nhwc(jnp.maximum(p6_nhwc, 0.0), p7_w, p7_b)
    # TODO(synk): returning NHWC (or folding these transposes into the consumer)
    # would save one read+write pass per output; NCHW kept to match the module.
    p6 = jnp.transpose(p6_nhwc, (0, 3, 1, 2))
    p7 = jnp.transpose(p7_nhwc, (0, 3, 1, 2))
    return [p6, p7]


class LastLevelP6P7:
    """JAX/Pallas port of maskrcnn_benchmark LastLevelP6P7 (forward pass)."""

    def __init__(self, in_channels, out_channels, key):
        k6, k7 = jax.random.split(key)

        def kaiming_uniform(k, c_out, c_in):
            # nn.init.kaiming_uniform_(w, a=1): bound = sqrt(6 / ((1+a^2)*fan_in))
            fan_in = c_in * 9
            bound = (3.0 / fan_in) ** 0.5
            return jax.random.uniform(k, (c_out, c_in, 3, 3), jnp.float32, -bound, bound)

        self.p6_w = kaiming_uniform(k6, out_channels, in_channels)
        self.p6_b = jnp.zeros((out_channels,), jnp.float32)
        self.p7_w = kaiming_uniform(k7, out_channels, out_channels)
        self.p7_b = jnp.zeros((out_channels,), jnp.float32)
        self.use_P5 = in_channels == out_channels

    def __call__(self, c5, p5):
        x = p5 if self.use_P5 else c5
        return _last_level_p6p7_forward(self.p6_w, self.p6_b, self.p7_w, self.p7_b, x)


if __name__ == "__main__":
    key = jax.random.PRNGKey(0)
    k_c5, k_p5, k_par = jax.random.split(key, 3)

    in_channels, out_channels = 4, 8      # in != out -> use_P5 False, x = c5
    N, H, W = 2, 16, 16
    c5 = jax.random.normal(k_c5, (N, in_channels, H, W), jnp.float32)
    p5 = jax.random.normal(k_p5, (N, out_channels, H, W), jnp.float32)

    module = LastLevelP6P7(in_channels, out_channels, k_par)
    p6, p7 = module(c5, p5)
    jax.block_until_ready((p6, p7))

    # Reference: XLA f32 conv with the same semantics as torch Conv2d 3x3/s2/p1.
    def ref_conv(x, w, b):
        y = jax.lax.conv_general_dilated(
            x, w, window_strides=(2, 2), padding=((1, 1), (1, 1)),
            dimension_numbers=("NCHW", "OIHW", "NCHW"),
            precision=jax.lax.Precision.HIGHEST)
        return y + b.reshape(1, -1, 1, 1)

    x_in = p5 if module.use_P5 else c5
    p6_ref = ref_conv(x_in, module.p6_w, module.p6_b)
    p7_ref = ref_conv(jnp.maximum(p6_ref, 0.0), module.p7_w, module.p7_b)

    assert p6.shape == (N, out_channels, H // 2, W // 2)
    assert p7.shape == (N, out_channels, H // 4, W // 4)
    # bf16 MXU operands / f32 accumulation vs. the f32 reference (intentional);
    # p7 additionally consumes a bf16-rounded relu(p6), hence the looser bound.
    assert jnp.allclose(p6, p6_ref, rtol=3e-2, atol=3e-2)
    assert jnp.allclose(p7, p7_ref, rtol=4e-2, atol=4e-2)

    print("KERNEL_OK")
</pallas_src>

<mosaic_0001>
module attributes {stable_mosaic.version = 11 : i64} {
  func.func @kernel(%arg0: i32, %arg1: i32, %arg2: memref<1x88x16xbf16, #tpu.memory_space<vmem>>, %arg3: memref<36x8xbf16, #tpu.memory_space<vmem>>, %arg4: memref<1x8xf32, #tpu.memory_space<vmem>>, %arg5: memref<1x72x8xf32, #tpu.memory_space<vmem>>) attributes {dimension_semantics = [#tpu.dimension_semantics<parallel>, #tpu.dimension_semantics<arbitrary>], iteration_bounds = array<i64: 2, 1>, scalar_prefetch = 0 : i64, scratch_operands = 0 : i64, tpu.core_type = #tpu.core_type<tc>, window_params = [{transform_indices = @transform_0, window_bounds = array<i64: 1, 88, 16>}, {pipeline_mode = #tpu.pipeline_mode<synchronous>, transform_indices = @transform_1, window_bounds = array<i64: 36, 8>}, {pipeline_mode = #tpu.pipeline_mode<synchronous>, transform_indices = @transform_2, window_bounds = array<i64: 1, 8>}, {transform_indices = @transform_3, window_bounds = array<i64: 1, 72, 8>}]} {
    %c0 = arith.constant 0 : index
    %c0_0 = arith.constant 0 : index
    %c0_1 = arith.constant 0 : index
    %0 = vector.load %arg2[%c0, %c0_0, %c0_1] : memref<1x88x16xbf16, #tpu.memory_space<vmem>>, vector<1x88x16xbf16>
    %1 = vector.shape_cast %0 : vector<1x88x16xbf16> to vector<88x16xbf16>
    %2 = vector.extract_strided_slice %1 {offsets = [0, 0], sizes = [72, 4], strides = [1, 1]} : vector<88x16xbf16> to vector<72x4xbf16>
    %3 = vector.extract_strided_slice %1 {offsets = [0, 4], sizes = [72, 4], strides = [1, 1]} : vector<88x16xbf16> to vector<72x4xbf16>
    %4 = vector.extract_strided_slice %1 {offsets = [1, 0], sizes = [72, 4], strides = [1, 1]} : vector<88x16xbf16> to vector<72x4xbf16>
    %5 = vector.extract_strided_slice %1 {offsets = [0, 8], sizes = [72, 4], strides = [1, 1]} : vector<88x16xbf16> to vector<72x4xbf16>
    %6 = vector.extract_strided_slice %1 {offsets = [0, 12], sizes = [72, 4], strides = [1, 1]} : vector<88x16xbf16> to vector<72x4xbf16>
    %7 = vector.extract_strided_slice %1 {offsets = [1, 8], sizes = [72, 4], strides = [1, 1]} : vector<88x16xbf16> to vector<72x4xbf16>
    %8 = vector.extract_strided_slice %1 {offsets = [9, 0], sizes = [72, 4], strides = [1, 1]} : vector<88x16xbf16> to vector<72x4xbf16>
    %9 = vector.extract_strided_slice %1 {offsets = [9, 4], sizes = [72, 4], strides = [1, 1]} : vector<88x16xbf16> to vector<72x4xbf16>
    %10 = vector.extract_strided_slice %1 {offsets = [10, 0], sizes = [72, 4], strides = [1, 1]} : vector<88x16xbf16> to vector<72x4xbf16>
    %11 = tpu.concatenate %2, %3, %4, %5, %6, %7, %8, %9, %10 in 1 : vector<72x4xbf16>, vector<72x4xbf16>, vector<72x4xbf16>, vector<72x4xbf16>, vector<72x4xbf16>, vector<72x4xbf16>, vector<72x4xbf16>, vector<72x4xbf16>, vector<72x4xbf16> -> vector<72x36xbf16>
    %c0_2 = arith.constant 0 : index
    %c0_3 = arith.constant 0 : index
    %12 = vector.load %arg3[%c0_2, %c0_3] : memref<36x8xbf16, #tpu.memory_space<vmem>>, vector<36x8xbf16>
    %cst = arith.constant dense<0.000000e+00> : vector<72x8xf32>
    %13 = tpu.matmul %11, %12, %cst {dimension_numbers = #tpu.dot_dimension_numbers<[1], [0], [0], [1], [0, 0, 1, 1], [], []>} : vector<72x36xbf16>, vector<36x8xbf16>, vector<72x8xf32> -> vector<72x8xf32>
    %c0_4 = arith.constant 0 : index
    %c0_5 = arith.constant 0 : index
    %14 = vector.load %arg4[%c0_4, %c0_5] : memref<1x8xf32, #tpu.memory_space<vmem>>, vector<1x8xf32>
    %15 = vector.broadcast %14 : vector<1x8xf32> to vector<72x8xf32>
    %16 = arith.addf %13, %15 : vector<72x8xf32>
    %c0_6 = arith.constant 0 : index
    %c0_7 = arith.constant 0 : index
    %c0_8 = arith.constant 0 : index
    %17 = vector.load %arg5[%c0_6, %c0_7, %c0_8] : memref<1x72x8xf32, #tpu.memory_space<vmem>>, vector<1x72x8xf32>
    %18 = vector.shape_cast %17 : vector<1x72x8xf32> to vector<72x8xf32>
    %19 = vector.shape_cast %16 : vector<72x8xf32> to vector<1x72x8xf32>
    tpu.vector_store %arg5[%c0_6, %c0_7, %c0_8], %19 {strides = array<i32>} : memref<1x72x8xf32, #tpu.memory_space<vmem>>, vector<1x72x8xf32>,
    return
  }
  func.func @transform_0(%arg0: i32, %arg1: i32) -> (i32, i32, i32) {
    %c0_i32 = arith.constant 0 : i32
    %c0_i32_0 = arith.constant 0 : i32
    %c0_i32_1 = arith.constant 0 : i32
    return %arg0, %c0_i32, %c0_i32_0 : i32, i32, i32
  }
  func.func @transform_1(%arg0: i32, %arg1: i32) -> (i32, i32) {
    %c0_i32 = arith.constant 0 : i32
    %c0_i32_0 = arith.constant 0 : i32
    %c0_i32_1 = arith.constant 0 : i32
    return %c0_i32, %c0_i32_0 : i32, i32
  }
  func.func @transform_2(%arg0: i32, %arg1: i32) -> (i32, i32) {
    %c0_i32 = arith.constant 0 : i32
    %c0_i32_0 = arith.constant 0 : i32
    %c0_i32_1 = arith.constant 0 : i32
    return %c0_i32, %c0_i32_0 : i32, i32
  }
  func.func @transform_3(%arg0: i32, %arg1: i32) -> (i32, i32, i32) {
    %c0_i32 = arith.constant 0 : i32
    %c0_i32_0 = arith.constant 0 : i32
    return %arg0, %arg1, %c0_i32 : i32, i32, i32
  }
}

module attributes {stable_mosaic.version = 11 : i64} {
  func.func @kernel(%arg0: i32, %arg1: i32, %arg2: memref<1x32x32xbf16, #tpu.memory_space<vmem>>, %arg3: memref<72x8xbf16, #tpu.memory_space<vmem>>, %arg4: memref<1x8xf32, #tpu.memory_space<vmem>>, %arg5: memref<1x24x8xf32, #tpu.memory_space<vmem>>) attributes {dimension_semantics = [#tpu.dimension_semantics<parallel>, #tpu.dimension_semantics<arbitrary>], iteration_bounds = array<i64: 2, 1>, scalar_prefetch = 0 : i64, scratch_operands = 0 : i64, tpu.core_type = #tpu.core_type<tc>, window_params = [{transform_indices = @transform_0, window_bounds = array<i64: 1, 32, 32>}, {pipeline_mode = #tpu.pipeline_mode<synchronous>, transform_indices = @transform_1, window_bounds = array<i64: 72, 8>}, {pipeline_mode = #tpu.pipeline_mode<synchronous>, transform_indices = @transform_2, window_bounds = array<i64: 1, 8>}, {transform_indices = @transform_3, window_bounds = array<i64: 1, 24, 8>}]} {
    %c0 = arith.constant 0 : index
    %c0_0 = arith.constant 0 : index
    %c0_1 = arith.constant 0 : index
    %0 = vector.load %arg2[%c0, %c0_0, %c0_1] : memref<1x32x32xbf16, #tpu.memory_space<vmem>>, vector<1x32x32xbf16>
    %1 = vector.shape_cast %0 : vector<1x32x32xbf16> to vector<32x32xbf16>
    %2 = vector.extract_strided_slice %1 {offsets = [0, 0], sizes = [24, 8], strides = [1, 1]} : vector<32x32xbf16> to vector<24x8xbf16>
    %3 = vector.extract_strided_slice %1 {offsets = [0, 8], sizes = [24, 8], strides = [1, 1]} : vector<32x32xbf16> to vector<24x8xbf16>
    %4 = vector.extract_strided_slice %1 {offsets = [1, 0], sizes = [24, 8], strides = [1, 1]} : vector<32x32xbf16> to vector<24x8xbf16>
    %5 = vector.extract_strided_slice %1 {offsets = [0, 16], sizes = [24, 8], strides = [1, 1]} : vector<32x32xbf16> to vector<24x8xbf16>
    %6 = vector.extract_strided_slice %1 {offsets = [0, 24], sizes = [24, 8], strides = [1, 1]} : vector<32x32xbf16> to vector<24x8xbf16>
    %7 = vector.extract_strided_slice %1 {offsets = [1, 16], sizes = [24, 8], strides = [1, 1]} : vector<32x32xbf16> to vector<24x8xbf16>
    %8 = vector.extract_strided_slice %1 {offsets = [5, 0], sizes = [24, 8], strides = [1, 1]} : vector<32x32xbf16> to vector<24x8xbf16>
    %9 = vector.extract_strided_slice %1 {offsets = [5, 8], sizes = [24, 8], strides = [1, 1]} : vector<32x32xbf16> to vector<24x8xbf16>
    %10 = vector.extract_strided_slice %1 {offsets = [6, 0], sizes = [24, 8], strides = [1, 1]} : vector<32x32xbf16> to vector<24x8xbf16>
    %11 = tpu.concatenate %2, %3, %4, %5, %6, %7, %8, %9, %10 in 1 : vector<24x8xbf16>, vector<24x8xbf16>, vector<24x8xbf16>, vector<24x8xbf16>, vector<24x8xbf16>, vector<24x8xbf16>, vector<24x8xbf16>, vector<24x8xbf16>, vector<24x8xbf16> -> vector<24x72xbf16>
    %c0_2 = arith.constant 0 : index
    %c0_3 = arith.constant 0 : index
    %12 = vector.load %arg3[%c0_2, %c0_3] : memref<72x8xbf16, #tpu.memory_space<vmem>>, vector<72x8xbf16>
    %cst = arith.constant dense<0.000000e+00> : vector<24x8xf32>
    %13 = tpu.matmul %11, %12, %cst {dimension_numbers = #tpu.dot_dimension_numbers<[1], [0], [0], [1], [0, 0, 1, 1], [], []>} : vector<24x72xbf16>, vector<72x8xbf16>, vector<24x8xf32> -> vector<24x8xf32>
    %c0_4 = arith.constant 0 : index
    %c0_5 = arith.constant 0 : index
    %14 = vector.load %arg4[%c0_4, %c0_5] : memref<1x8xf32, #tpu.memory_space<vmem>>, vector<1x8xf32>
    %15 = vector.broadcast %14 : vector<1x8xf32> to vector<24x8xf32>
    %16 = arith.addf %13, %15 : vector<24x8xf32>
    %c0_6 = arith.constant 0 : index
    %c0_7 = arith.constant 0 : index
    %c0_8 = arith.constant 0 : index
    %17 = vector.load %arg5[%c0_6, %c0_7, %c0_8] : memref<1x24x8xf32, #tpu.memory_space<vmem>>, vector<1x24x8xf32>
    %18 = vector.shape_cast %17 : vector<1x24x8xf32> to vector<24x8xf32>
    %19 = vector.shape_cast %16 : vector<24x8xf32> to vector<1x24x8xf32>
    tpu.vector_store %arg5[%c0_6, %c0_7, %c0_8], %19 {strides = array<i32>} : memref<1x24x8xf32, #tpu.memory_space<vmem>>, vector<1x24x8xf32>,
    return
  }
  func.func @transform_0(%arg0: i32, %arg1: i32) -> (i32, i32, i32) {
    %c0_i32 = arith.constant 0 : i32
    %c0_i32_0 = arith.constant 0 : i32
    %c0_i32_1 = arith.constant 0 : i32
    return %arg0, %c0_i32, %c0_i32_0 : i32, i32, i32
  }
  func.func @transform_1(%arg0: i32, %arg1: i32) -> (i32, i32) {
    %c0_i32 = arith.constant 0 : i32
    %c0_i32_0 = arith.constant 0 : i32
    %c0_i32_1 = arith.constant 0 : i32
    return %c0_i32, %c0_i32_0 : i32, i32
  }
  func.func @transform_2(%arg0: i32, %arg1: i32) -> (i32, i32) {
    %c0_i32 = arith.constant 0 : i32
    %c0_i32_0 = arith.constant 0 : i32
    %c0_i32_1 = arith.constant 0 : i32
    return %c0_i32, %c0_i32_0 : i32, i32
  }
  func.func @transform_3(%arg0: i32, %arg1: i32) -> (i32, i32, i32) {
    %c0_i32 = arith.constant 0 : i32
    %c0_i32_0 = arith.constant 0 : i32
    return %arg0, %arg1, %c0_i32 : i32, i32, i32
  }
}

</mosaic_0001>

<bundles_post_ra>
// kernel: _last_level_p6p7_forward.2
= control target key start
LH: loop header
LB: loop body
LE: loop exit
PB: predicated region body
PF: predicated region fallthrough
CT: control target
= control target key end

     0   :  { %s817_s12 = smov 0   ;;  %s819_s13 = smov 0   ;;  %s1054_s0 = inlined_call_operand.vmem [shape: bf16[2,88,16], index: 0, kind: input, shape index: {}]   ;;  %s1055_s1 = inlined_call_operand.vmem [shape: bf16[36,8], index: 1, kind: input, shape index: {}]   ;;  %s1056_s2 = inlined_call_operand.vmem [shape: f32[1,8], index: 2, kind: input, shape index: {}]   ;;  %s1057_s3 = inlined_call_operand.vmem [shape: f32[2,72,8], index: 3, kind: output, shape index: {}]  }
   0x1   :  { %s821_s14 = smov 0  }
   0x2 LB: > { %s25_s15 = sadd.s32 1, %s784_s13  ;;  %p654_p0 = scmp.ge.s32.totalorder %s788_s14, 1  ;;  %s788_s14 = sphi %s821_s14, %s13_s14   ;;  %s784_s13 = sphi %s819_s13, %s1059_s13   ;;  %s780_s12 = sphi %s817_s12, %s1058_s12  }
   0x3   : > { %p27_p1 = scmp.ge.s32.totalorder %s25_s15, 2  ;;  %p151_p2 = scmp.lt.s32.totalorder %s788_s14, 3 }
   0x5   : > { %s1061_s15 = smov (%p27_p1, %s25_s15), 0  ;;  %p152_p3 = pnand %p654_p0, %p151_p2 }
   0x6   : > { %p179_p4 = scmp.lt.s32.totalorder (!%p152_p3), %s780_s12, 1  ;;  %s790_s20 = smov (!%p152_p3), 4   ;;  %vm232_vm0 = vsmask.f32 (!%p152_p3), 7424  ;;  %vm358_vm1 = vcmask (!%p152_p3), 1046528   ;;  %v763_v53 = vld [vmem:[%s1055_s1] sm:$0xff] (!%p152_p3)  }
   0x7   : > { %155 = sbr.rel (%p152_p3) target bundleno = 405 (0x195), region = 32  ;;  %s791_s21 = smov (!%p152_p3), 12   ;;  %v795_v58 = vmov (!%p152_p3), 0.0   ;;  %v764_v60 = vld [vmem:[%s1055_s1 + $0x8] sm:$0xff] (!%p152_p3)   ;;  %vm796_vm2 = vmmov (!%p152_p3), 0   ;;  %vm484_vm3 = vcmask (!%p152_p3), 1041408  }
   0x8   : > { %s792_s22 = smov (!%p152_p3), 32   ;;  %s793_s23 = smov (!%p152_p3), 24   ;;  %687 = vmatprep.subr.bf16.mxu0 (!%p152_p3), %v795_v58  ;;  %693 = vmatprep.mubr.msk.bf16.mxu0 (!%p152_p3), %vm796_vm2, %v795_v58  ;;  %vm379_vm4 = vcmask (!%p152_p3), 64512   ;;  %vm390_vm5 = vcmask (!%p152_p3), 97280   ;;  %vm401_vm6 = vcmask (!%p152_p3), 130048   ;;  %vm407_vm7 = vcmask (!%p152_p3), 162816  }
   0x9   : > { %s794_s26 = smov (!%p152_p3), 8   ;;  %688 = vmatpush3.bf16.msra.mxu0 (!%p152_p3), %v763_v53  ;;  %713 = vmatprep.subr.bf16.mxu1 (!%p152_p3), %v795_v58  ;;  %vm418_vm8 = vcmask (!%p152_p3), 195584   ;;  %vm429_vm9 = vcmask (!%p152_p3), 228352   ;;  %vm435_vm10 = vcmask (!%p152_p3), 261120   ;;  %vm473_vm11 = vcmask (!%p152_p3), 293888  }
   0xa   : > { %689 = vmatprep.subr.bf16.mxu0 (!%p152_p3), %v795_v58  ;;  %705 = vmatprep.mubr.msk.bf16.mxu1 (!%p152_p3), %vm796_vm2, %v795_v58 }
   0xb   : > { %716 = vmatpush3.bf16.msra.mxu1 (!%p152_p3), %v763_v53 }
   0xc   : > { %714 = vmatprep.subr.bf16.mxu1 (!%p152_p3), %v795_v58 }
   0xd   : > { %690 = vmatpush3.bf16.msra.mxu0 (!%p152_p3), %v764_v60 }
   0xe   : > { %s1063_s12 = smov (!%p179_p4, %s780_s12), 1  ;;  %691 = vmatprep.subr.bf16.mxu0 %v795_v58 }
   0xf   : > { %s719_s16 = smul.u32 44, %s1063_s12  ;;  %717 = vmatpush3.bf16.msra.mxu1 %v764_v60 }
  0x10   : > { %715 = vmatprep.subr.bf16.mxu1 %v795_v58  ;;  %s720_s4 = smul.u32 72, %s1063_s12 }
  0x11   : > { %s841_s19 = scalar_lea.vmem %s1054_s0, %s719_s16 }
  0x12   : > { %v195_v0 = vld [vmem:[%s841_s19] sm:$0xf]  ;;  %v196_v1 = vld [vmem:[%s841_s19 + $0x4] sm:$0xf]  ;;  %v197_v2 = vld [vmem:[%s841_s19 + $0x8] sm:$0xf]  ;;  %s1025_s9 = scalar_lea.vmem %s1057_s3, %s720_s4 }
  0x13   : > { %v846_v3 = vcombine.low %v195_v0, %v196_v1  ;;  %v198_v4 = vld [vmem:[%s841_s19 + $0xc] sm:$0xf]  ;;  %v199_v5 = vld [vmem:[%s841_s19 + $0x10] sm:$0xf]  ;;  %v663_v6 = vcombine.low %v196_v1, %v197_v2  ;;  %v200_v7 = vld [vmem:[%s841_s19 + $0x14] sm:$0xf] }
  0x14   : > { %v851_v8 = vcombine.low %v197_v2, %v198_v4  ;;  %v853_v9 = vcombine.low %v198_v4, %v199_v5  ;;  %v201_v10 = vld [vmem:[%s841_s19 + $0x18] sm:$0xf]  ;;  %v202_v11 = vld [vmem:[%s841_s19 + $0x1c] sm:$0xf]  ;;  %v857_v12 = vcombine.low %v199_v5, %v200_v7  ;;  %v864_v17 = vld [vmem:[%s841_s19 + $0x20] sm:$0xf] }
  0x15   : > { %282 = vrot.lane.b32.xlu0 %v846_v3, %s790_s20  ;;  %v234_v13 = vshrl.u32 %v846_v3, 16  ;;  %v236_v14 = vshll.u32 %v846_v3, 16  ;;  %v359_v15 = vrot.slane %v663_v6, 1  ;;  %v310_v16 = vshrl.u32 %v663_v6, 16  ;;  %v204_v22 = vld [vmem:[%s841_s19 + $0x24] sm:$0xf] }
  0x16   : > { %v241_v18 = vshll.u32 %v851_v8, 16  ;;  %v360_v19 = vrot.slane %v853_v9, 1  ;;  %v312_v20 = vshll.u32 %v663_v6, 16  ;;  %v317_v21 = vshll.u32 %v853_v9, 16  ;;  %v205_v38 = vld [vmem:[%s841_s19 + $0x28] sm:$0xf] }
  0x17   : > { %v238_v23 = vrot.slane %v236_v14, 1  ;;  %v870_v24 = vcombine.low %v201_v10, %v202_v11  ;;  %v872_v28 = vcombine.low %v200_v7, %v201_v10  ;;  %v245_v30 = vshrl.u32 %v851_v8, 16  ;;  %v765_v1 = vld [vmem:[%s1055_s1 + $0x10] ss:$0 sps:$4 sm:$0x33]  }
  0x18   : > { %v243_v25 = vrot.slane %v241_v18, 1  ;;  %v314_v26 = vrot.slane %v312_v20, 1  ;;  %v319_v27 = vrot.slane %v317_v21, 1  ;;  %v249_v31 = vshll.u32 %v857_v12, 16 }
  0x19   : > { %284 = vrot.lane.b32.xlu0 %v851_v8, %s790_s20  ;;  %v239_v29 = vor.u32 %v238_v23, %v234_v13  ;;  %v879_v32 = vcombine.low %v864_v17, %v204_v22  ;;  %v361_v33 = vsel %vm358_vm1, %v359_v15, %v360_v19  ;;  %v885_v35 = vcombine.low %v202_v11, %v864_v17 }
  0x1a   : > { %v315_v34 = vor.u32 %v314_v26, %v310_v16  ;;  %v257_v36 = vshll.u32 %v870_v24, 16  ;;  %v247_v39 = vor.u32 %v245_v30, %v243_v25  ;;  %v261_v40 = vshrl.u32 %v870_v24, 16 }
  0x1b   : > { %v244_v37 = vsel %vm232_vm0, %v239_v29, %v243_v25  ;;  %v251_v42 = vrot.slane %v249_v31, 1  ;;  %v265_v44 = vshll.u32 %v879_v32, 16  ;;  %v895_v45 = vcombine.low %v204_v22, %v205_v38 }
  0x1c   : > { %292 = vrot.lane.b32.xlu1 %v244_v37, %s791_s21  ;;  %v320_v41 = vsel %vm232_vm0, %v315_v34, %v319_v27  ;;  %v259_v43 = vrot.slane %v257_v36, 1  ;;  %v321_v46 = vshrl.u32 %v853_v9, 16  ;;  %v325_v47 = vshll.u32 %v872_v28, 16 }
  0x1d   : > { %368 = vrot.lane.b32.xlu0 %v361_v33, %s792_s22  ;;  %v333_v48 = vshll.u32 %v885_v35, 16  ;;  %v252_v49 = vsel %vm232_vm0, %v247_v39, %v251_v42  ;;  %v267_v51 = vrot.slane %v265_v44, 1  ;;  %v337_v52 = vshrl.u32 %v885_v35, 16 }
  0x1e   : > { %v263_v50 = vor.u32 %v261_v40, %v259_v43  ;;  %v323_v54 = vor.u32 %v321_v46, %v319_v27  ;;  %v327_v55 = vrot.slane %v325_v47, 1  ;;  %v341_v57 = vshll.u32 %v895_v45, 16 }
  0x1f   : > { %v335_v56 = vrot.slane %v333_v48, 1  ;;  %v253_v0 = vshrl.u32 %v857_v12, 16  ;;  %v486_v5 = vsel %vm484_vm3, %v765_v1, 0  ;;  %v362_v6 = vrot.slane %v872_v28, 1 }
  0x20   : > { %348 = vrot.lane.b32.xlu1 %v320_v41, %s793_s23  ;;  %v268_v59 = vsel %vm232_vm0, %v263_v50, %v267_v51  ;;  %v328_v61 = vsel %vm232_vm0, %v323_v54, %v327_v55  ;;  %v343_v63 = vrot.slane %v341_v57, 1  ;;  %692 = vmatpush3.bf16.msra.mxu0 %v486_v5  ;;  %v364_v11 = vrot.slane %v885_v35, 1 }
  0x21   : > { %288 = vrot.lane.b32.xlu0 %v870_v24, %s790_s20  ;;  %v339_v62 = vor.u32 %v337_v52, %v335_v56  ;;  %v255_v4 = vor.u32 %v253_v0, %v251_v42  ;;  %718 = vmatpush3.bf16.msra.mxu1 %v486_v5  ;;  %v363_v10 = vsel %vm358_vm1, %v360_v19, %v362_v6  ;;  %v366_v13 = vrot.slane %v895_v45, 1 }
  0x22   : > { %v329_v14 = vshrl.u32 %v872_v28, 16  ;;  %v269_v15 = vshrl.u32 %v879_v32, 16  ;;  %v952_v9 = vcombine.low %v864_v17, %v864_v17  ;;  %v345_v20 = vshrl.u32 %v895_v45, 16 }
  0x23   : > { %v344_v2 = vsel %vm232_vm0, %v339_v62, %v343_v63  ;;  %v260_v7 = vsel %vm232_vm0, %v255_v4, %v259_v43  ;;  %v367_v16 = vsel %vm358_vm1, %v364_v11, %v366_v13  ;;  %v365_v17 = vsel %vm358_vm1, %v362_v6, %v364_v11 }
  0x24   : > { %274 = vrot.lane.b32.xlu1 %v252_v49, %s794_s26  ;;  %v331_v18 = vor.u32 %v329_v14, %v327_v55  ;;  %v271_v19 = vor.u32 %v269_v15, %v267_v51  ;;  %v347_v22 = vor.u32 %v345_v20, %v343_v63  ;;  %v668_v20 = vld [vmem:[%s1056_s2] ss:$0 sm:$0xff] }
  0x25   : > { %272 = vrot.lane.b32.xlu0 %v244_v37, %s794_s26 }
  0x26   : > { %v336_v21 = vsel %vm232_vm0, %v331_v18, %v335_v56 }
  0x28   : > { %278 = vrot.lane.b32.xlu1 %v268_v59, %s794_s26 }
  0x29   : > { %350 = vrot.lane.b32.xlu0 %v328_v61, %s793_s23 }
  0x2c   : > { %294 = vrot.lane.b32.xlu1 %v252_v49, %s791_s21 }
  0x2d   : > { %354 = vrot.lane.b32.xlu0 %v344_v2, %s793_s23 }
  0x30   : > { %298 = vrot.lane.b32.xlu1 %v268_v59, %s791_s21 }
  0x31   : > { %276 = vrot.lane.b32.xlu0 %v260_v7, %s794_s26 }
  0x34   : > { %370 = vrot.lane.b32.xlu1 %v363_v10, %s792_s22 }
  0x35   : > { %286 = vrot.lane.b32.xlu0 %v857_v12, %s790_s20 }
  0x38   : > { %374 = vrot.lane.b32.xlu1 %v367_v16, %s792_s22 }
  0x39   : > { %290 = vrot.lane.b32.xlu0 %v952_v9, %s790_s20 }
  0x3c   : > { %280 = vrot.lane.b32.xlu1 %v271_v19, %s794_s26 }
  0x3d   : > { %352 = vrot.lane.b32.xlu0 %v336_v21, %s793_s23 }
  0x40   : > { %296 = vrot.lane.b32.xlu1 %v260_v7, %s791_s21 }
  0x41   : > { %356 = vrot.lane.b32.xlu0 %v347_v22, %s793_s23 }
  0x44   : > { %300 = vrot.lane.b32.xlu1 %v271_v19, %s791_s21 }
  0x45   : > { %376 = vrot.lane.b32.xlu0 %v366_v13, %s792_s22 }
  0x48   : > { %372 = vrot.lane.b32.xlu1 %v365_v17, %s792_s22 }
  0x87   : > { %v283_v23 = vpop.permute.xlu0 %282 }
  0x8b   : > { %v285_v25 = vpop.permute.xlu0 %284 }
  0x8e   : > { %v293_v26 = vpop.permute.xlu1 %292 }
  0x8f   : > { %v369_v27 = vpop.permute.xlu0 %368 }
  0x92   : > { %v349_v28 = vpop.permute.xlu1 %348 }
  0x93   : > { %v289_v29 = vpop.permute.xlu0 %288 }
  0x96   : > { %v275_v30 = vpop.permute.xlu1 %274 }
  0x97   : > { %v273_v31 = vpop.permute.xlu0 %272  ;;  %v383_v33 = vsel %vm379_vm4, %v851_v8, %v275_v30 }
  0x98   : > { %v381_v32 = vsel %vm379_vm4, %v846_v3, %v273_v31  ;;  %v394_v39 = vsel %vm390_vm5, %v383_v33, %v285_v25 }
  0x99   : > { %v392_v34 = vsel %vm390_vm5, %v381_v32, %v283_v23  ;;  %v403_v43 = vsel %vm401_vm6, %v394_v39, %v285_v25 }
  0x9a   : > { %v402_v35 = vsel %vm401_vm6, %v392_v34, %v283_v23  ;;  %v279_v36 = vpop.permute.xlu1 %278 }
  0x9b   : > { %v351_v37 = vpop.permute.xlu0 %350  ;;  %v409_v38 = vsel %vm407_vm7, %v402_v35, %v293_v26  ;;  %v387_v3 = vsel %vm379_vm4, %v870_v24, %v279_v36 }
  0x9c   : > { %v420_v40 = vsel %vm418_vm8, %v409_v38, %v349_v28  ;;  %v398_v45 = vsel %vm390_vm5, %v387_v3, %v289_v29 }
  0x9d   : > { %v430_v8 = vsel %vm429_vm9, %v420_v40, %v349_v28  ;;  %v405_v48 = vsel %vm401_vm6, %v398_v45, %v289_v29 }
  0x9e   : > { %v295_v41 = vpop.permute.xlu1 %294  ;;  %v437_v42 = vsel %vm435_vm10, %v430_v8, %v369_v27 }
  0x9f   : > { %694 = vmatmul.mubr.msk.bf16.vlgmr.msra.gmra.mrb[0].mxu0 %vm473_vm11, %v437_v42  ;;  %v355_v44 = vpop.permute.xlu0 %354  ;;  %v411_v46 = vsel %vm407_vm7, %v403_v43, %v295_v41 }
  0xa0   : > { %697 = vmatprep.mubr.msk.bf16.mxu0 %vm796_vm2, %v795_v58  ;;  %v422_v24 = vsel %vm418_vm8, %v411_v46, %v351_v37 }
  0xa1   : > { %v431_v52 = vsel %vm429_vm9, %v422_v24, %v351_v37 }
  0xa2   : > { %v299_v47 = vpop.permute.xlu1 %298 }
  0xa3   : > { %v277_v49 = vpop.permute.xlu0 %276  ;;  %v415_v50 = vsel %vm407_vm7, %v405_v48, %v299_v47 }
  0xa4   : > { %v426_v53 = vsel %vm418_vm8, %v415_v50, %v355_v44  ;;  %v385_v61 = vsel %vm379_vm4, %v857_v12, %v277_v49 }
  0xa5   : > { %v433_v57 = vsel %vm429_vm9, %v426_v53, %v355_v44 }
  0xa6   : > { %v371_v51 = vpop.permute.xlu1 %370 }
  0xa7   : > { %v439_v54 = vsel %vm435_vm10, %v431_v52, %v371_v51  ;;  %v287_v55 = vpop.permute.xlu0 %286 }
  0xa8   : > { %698 = vmatmul.mubr.msk.bf16.gmra.mrb[4].mxu0 %vm473_vm11, %v439_v54  ;;  %v396_v0 = vsel %vm390_vm5, %v385_v61, %v287_v55 }
  0xa9   : > { %701 = vmatprep.mubr.msk.bf16.mxu0 %vm796_vm2, %v795_v58  ;;  %v404_v4 = vsel %vm401_vm6, %v396_v0, %v287_v55 }
  0xaa   : > { %v375_v56 = vpop.permute.xlu1 %374 }
  0xab   : > { %v443_v59 = vsel %vm435_vm10, %v433_v57, %v375_v56  ;;  %v291_v60 = vpop.permute.xlu0 %290 }
  0xac   : > { %706 = vmatmul.mubr.msk.bf16.vlgmr.msra.gmra.mrb[0].mxu1 %vm473_vm11, %v443_v59 }
  0xad   : > { %709 = vmatprep.mubr.msk.bf16.mxu1 %vm796_vm2, %v795_v58 }
  0xae   : > { %v281_v62 = vpop.permute.xlu1 %280 }
  0xaf   : > { %v353_v63 = vpop.permute.xlu0 %352  ;;  %v389_v1 = vsel %vm379_vm4, %v952_v9, %v281_v62 }
  0xb0   : > { %v400_v5 = vsel %vm390_vm5, %v389_v1, %v291_v60 }
  0xb1   : > { %v406_v10 = vsel %vm401_vm6, %v400_v5, %v291_v60 }
  0xb2   : > { %v297_v2 = vpop.permute.xlu1 %296 }
  0xb3   : > { %v357_v6 = vpop.permute.xlu0 %356  ;;  %v413_v7 = vsel %vm407_vm7, %v404_v4, %v297_v2 }
  0xb4   : > { %v424_v58 = vsel %vm418_vm8, %v413_v7, %v353_v63 }
  0xb5   : > { %v432_v18 = vsel %vm429_vm9, %v424_v58, %v353_v63 }
  0xb6   : > { %v301_v12 = vpop.permute.xlu1 %300 }
  0xb7   : > { %v417_v11 = vsel %vm407_vm7, %v406_v10, %v301_v12  ;;  %v377_v13 = vpop.permute.xlu0 %376 }
  0xb8   : > { %v428_v14 = vsel %vm418_vm8, %v417_v11, %v357_v6 }
  0xb9   : > { %v434_v15 = vsel %vm429_vm9, %v428_v14, %v357_v6 }
  0xba   : > { %v445_v16 = vsel %vm435_vm10, %v434_v15, %v377_v13  ;;  %v373_v9 = vpop.permute.xlu1 %372 }
  0xbb   : > { %v441_v19 = vsel %vm435_vm10, %v432_v18, %v373_v9  ;;  %710 = vmatmul.mubr.msk.bf16.gmra.mrb[4].mxu1 %vm473_vm11, %v445_v16 }
  0xbc   : > { %702 = vmatmul.mubr.msk.bf16.gmra.mrb[8].mxu0 %vm473_vm11, %v441_v19 }
 0x172   : > { %v522_v21 = vpop.f32.mrb[0].mxu0 }
 0x173   : > { %v523_v22 = vadd.f32 %v668_v20, %v522_v21  ;;  %v695_v17 = vpop.f32.mrb[1].mxu0 }
 0x174   : > { %v525_v23 = vpop.f32.mrb[2].mxu0 }
 0x175   : > { %560 = vst.msk [vmem:[%s1025_s9] sm:$0xff] %vm379_vm4, %v523_v22  ;;  %v526_v25 = vadd.f32 %v668_v20, %v525_v23  ;;  %v696_v26 = vpop.f32.mrb[3].mxu0 }
 0x177   : > { %561 = vst.msk [vmem:[%s1025_s9 + $0x8] sm:$0xff] %vm379_vm4, %v526_v25 }
 0x17b   : > { %v530_v27 = vpop.f32.mrb[4].mxu0 }
 0x17c   : > { %v531_v28 = vadd.f32 %v668_v20, %v530_v27  ;;  %v699_v29 = vpop.f32.mrb[5].mxu0 }
 0x17d   : > { %v533_v30 = vpop.f32.mrb[6].mxu0 }
 0x17e   : > { %562 = vst.msk [vmem:[%s1025_s9 + $0x10] sm:$0xff] %vm379_vm4, %v531_v28  ;;  %v534_v31 = vadd.f32 %v668_v20, %v533_v30  ;;  %v700_v32 = vpop.f32.mrb[7].mxu0 }
 0x17f   : > { %v546_v33 = vpop.f32.mrb[0].mxu1 }
 0x180   : > { %563 = vst.msk [vmem:[%s1025_s9 + $0x18] sm:$0xff] %vm379_vm4, %v534_v31  ;;  %v547_v34 = vadd.f32 %v668_v20, %v546_v33  ;;  %v707_v35 = vpop.f32.mrb[1].mxu1 }
 0x181   : > { %v549_v36 = vpop.f32.mrb[2].mxu1 }
 0x182   : > { %566 = vst.msk [vmem:[%s1025_s9 + $0x30] sm:$0xff] %vm379_vm4, %v547_v34  ;;  %v550_v37 = vadd.f32 %v668_v20, %v549_v36  ;;  %v708_v38 = vpop.f32.mrb[3].mxu1 }
 0x184   : > { %567 = vst.msk [vmem:[%s1025_s9 + $0x38] sm:$0xff] %vm379_vm4, %v550_v37 }
 0x18e   : > { %v554_v39 = vpop.f32.mrb[4].mxu1 }
 0x18f   : > { %v555_v40 = vadd.f32 %v668_v20, %v554_v39  ;;  %v538_v3 = vpop.f32.mrb[8].mxu0  ;;  %v711_v8 = vpop.f32.mrb[5].mxu1 }
 0x190   : > { %v539_v41 = vadd.f32 %v668_v20, %v538_v3  ;;  %v703_v42 = vpop.f32.mrb[9].mxu0  ;;  %v557_v43 = vpop.f32.mrb[6].mxu1 }
 0x191   : > { %568 = vst.msk [vmem:[%s1025_s9 + $0x40] sm:$0xff] %vm379_vm4, %v555_v40  ;;  %v541_v44 = vpop.f32.mrb[10].mxu0  ;;  %v712_v45 = vpop.f32.mrb[7].mxu1 }
 0x192   : > { %564 = vst.msk [vmem:[%s1025_s9 + $0x20] sm:$0xff] %vm379_vm4, %v539_v41  ;;  %v542_v46 = vadd.f32 %v668_v20, %v541_v44  ;;  %v704_v47 = vpop.f32.mrb[11].mxu0 }
 0x194   : > { %565 = vst.msk [vmem:[%s1025_s9 + $0x28] sm:$0xff] %vm379_vm4, %v542_v46 }
 0x195 PF: > { %s13_s14 = sadd.s32 1, %s788_s14   ;;  %s1058_s12 = smov %s784_s13 }
 0x196   : > { %p10_p5 = scmp.ge.s32.totalorder %s13_s14, 4   ;;  %s1059_s13 = smov %s1061_s15 }
 0x198   :  { %12 = sbr.rel (!%p10_p5) target bundleno = 2 (0x2), region = 62 }

// kernel: _last_level_p6p7_forward.3
= control target key start
LH: loop header
LB: loop body
LE: loop exit
PB: predicated region body
PF: predicated region fallthrough
CT: control target
= control target key end

     0   :  { %s606_s12 = smov 0   ;;  %s608_s13 = smov 0   ;;  %s668_s0 = inlined_call_operand.vmem [shape: bf16[2,32,32], index: 0, kind: input, shape index: {}]   ;;  %s669_s1 = inlined_call_operand.vmem [shape: bf16[72,8], index: 1, kind: input, shape index: {}]   ;;  %s670_s2 = inlined_call_operand.vmem [shape: f32[1,8], index: 2, kind: input, shape index: {}]   ;;  %s671_s3 = inlined_call_operand.vmem [shape: f32[2,24,8], index: 3, kind: output, shape index: {}]  }
   0x1   :  { %s610_s14 = smov 0  }
   0x2 LB: > { %s25_s15 = sadd.s32 1, %s575_s13  ;;  %p479_p0 = scmp.ge.s32.totalorder %s579_s14, 1  ;;  %s579_s14 = sphi %s610_s14, %s13_s14   ;;  %s575_s13 = sphi %s608_s13, %s673_s13   ;;  %s571_s12 = sphi %s606_s12, %s672_s12  }
   0x3   : > { %p27_p1 = scmp.ge.s32.totalorder %s25_s15, 2  ;;  %p151_p2 = scmp.lt.s32.totalorder %s579_s14, 3 }
   0x5   : > { %s675_s15 = smov (%p27_p1, %s25_s15), 0  ;;  %p152_p3 = pnand %p479_p0, %p151_p2 }
   0x6   : > { %p179_p4 = scmp.lt.s32.totalorder (!%p152_p3), %s571_s12, 1  ;;  %v552_v0 = vld [vmem:[%s669_s1] sm:$0xff] (!%p152_p3)   ;;  %v553_v1 = vld [vmem:[%s669_s1 + $0x8] sm:$0xff] (!%p152_p3)   ;;  %v554_v5 = vld [vmem:[%s669_s1 + $0x10] sm:$0xff] (!%p152_p3)   ;;  %s581_s26 = smov (!%p152_p3), 8   ;;  %vm339_vm1 = vcmask (!%p152_p3), 1043456  }
   0x7   : > { %155 = sbr.rel (%p152_p3) target bundleno = 377 (0x179), region = 32  ;;  %504 = vmatprep.subr.bf16.mxu0 (!%p152_p3), %v552_v0  ;;  %v555_v13 = vld [vmem:[%s669_s1 + $0x18] sm:$0xff] (!%p152_p3)   ;;  %vm210_vm0 = vsmask.f32 (!%p152_p3), 7424  ;;  %v556_v19 = vld [vmem:[%s669_s1 + $0x20] ss:$0 sps:$4 sm:$0xff] (!%p152_p3)  }
   0x8   : > { %505 = vmatpush3.bf16.msra.mxu0 (!%p152_p3), %v552_v0  ;;  %s582_s4 = smov (!%p152_p3), 16   ;;  %s583_s5 = smov (!%p152_p3), 24   ;;  %v341_v24 = vsel (!%p152_p3), %vm339_vm1, %v556_v19, 0  ;;  %vm238_vm2 = vsmask.f32 (!%p152_p3), 5376  ;;  %vm250_vm3 = vcmask (!%p152_p3), 1044480  }
   0x9   : > { %506 = vmatprep.subr.bf16.mxu0 (!%p152_p3), %v553_v1  ;;  %s584_s6 = smov (!%p152_p3), 48   ;;  %s585_s7 = smov (!%p152_p3), 64   ;;  %vm260_vm4 = vcmask (!%p152_p3), 130048   ;;  %vm265_vm5 = vcmask (!%p152_p3), 195584   ;;  %vm270_vm6 = vcmask (!%p152_p3), 261120   ;;  %vm273_vm7 = vcmask (!%p152_p3), 326656  }
   0xa   : > { %vm278_vm8 = vcmask (!%p152_p3), 392192   ;;  %vm283_vm9 = vcmask (!%p152_p3), 457728   ;;  %vm286_vm10 = vcmask (!%p152_p3), 523264   ;;  %vm334_vm11 = vcmask (!%p152_p3), 588800   ;;  %v486_v54 = vld [vmem:[%s670_s2] ss:$0 sm:$0xff] (!%p152_p3) }
   0xb   : > { %vm258_vm12 = vcmask (!%p152_p3), 64512  }
   0xc   : > { %507 = vmatpush3.bf16.msra.mxu0 (!%p152_p3), %v553_v1 }
   0xd   : > { %508 = vmatprep.subr.bf16.mxu0 (!%p152_p3), %v554_v5 }
   0xe   : > { %s677_s12 = smov (!%p179_p4, %s571_s12), 1 }
   0xf   : > { %s496_s18 = sshll.u32 %s677_s12, 4  ;;  %s519_s8 = smul.u32 24, %s677_s12 }
  0x10   : > { %s183_s23 = scalar_lea.vmem %s668_s0, %s496_s18  ;;  %509 = vmatpush3.bf16.msra.mxu0 %v554_v5 }
  0x11   : > { %v636_v2 = vld [vmem:[%s183_s23] sm:$0xff]   ;;  %v197_v3 = vld [vmem:[%s183_s23 + $0x8] sm:$0xf]  ;;  %v198_v4 = vld [vmem:[%s183_s23 + $0xc] sm:$0xf]  ;;  %510 = vmatprep.subr.bf16.mxu0 %v555_v13  ;;  %s192_s17 = scalar_lea.vmem %s671_s3, %s519_s8 }
  0x12   : > { %230 = vrot.lane.b32.xlu1 %v636_v2, %s581_s26  ;;  %v484_v6 = vcombine.low %v197_v3, %v197_v3  ;;  %v485_v7 = vcombine.low %v197_v3, %v198_v4  ;;  %v214_v8 = vshll.u32 %v636_v2, 16  ;;  %v212_v9 = vshrl.u32 %v636_v2, 16 }
  0x13   : > { %v251_v28 = vrot.slane %v636_v2, 3 }
  0x14   : > { %v219_v10 = vshll.u32 %v485_v7, 16  ;;  %v223_v11 = vshrl.u32 %v485_v7, 16  ;;  %v216_v12 = vrot.slane %v214_v8, 1  ;;  %v239_v22 = vrot.slane %v212_v9, 2  ;;  %511 = vmatpush3.bf16.msra.mxu0 %v555_v13 }
  0x15   : > { %v240_v23 = vrot.slane %v214_v8, 3  ;;  %518 = vmatprep.subr.msk.bf16.mxu0 %vm339_vm1, %v556_v19  ;;  %v252_v25 = vrot.slane %v485_v7, 3 }
  0x16   : > { %232 = vrot.lane.b32.xlu1 %v484_v6, %s581_s26  ;;  %v221_v14 = vrot.slane %v219_v10, 1  ;;  %v242_v15 = vrot.slane %v223_v11, 2  ;;  %v243_v16 = vrot.slane %v219_v10, 3  ;;  %v217_v17 = vor.u32 %v216_v12, %v212_v9 }
  0x17   : > { %v241_v26 = vor.u32 %v240_v23, %v239_v22  ;;  %v253_v29 = vsel %vm250_vm3, %v251_v28, %v252_v25 }
  0x18   : > { %v225_v18 = vor.u32 %v223_v11, %v221_v14  ;;  %v244_v20 = vor.u32 %v243_v16, %v242_v15  ;;  %v222_v21 = vsel %vm210_vm0, %v217_v17, %v221_v14  ;;  %513 = vmatpush3.bf16.msra.mxu0 %v341_v24 }
  0x1a   : > { %228 = vrot.lane.b32.xlu0 %v225_v18, %s582_s4  ;;  %236 = vrot.lane.b32.xlu1 %v225_v18, %s583_s5  ;;  %v245_v27 = vsel %vm238_vm2, %v241_v26, %v244_v20 }
  0x1e   : > { %226 = vrot.lane.b32.xlu0 %v222_v21, %s582_s4  ;;  %248 = vrot.lane.b32.xlu1 %v244_v20, %s584_s6 }
  0x22   : > { %234 = vrot.lane.b32.xlu0 %v222_v21, %s583_s5  ;;  %256 = vrot.lane.b32.xlu1 %v252_v25, %s585_s7 }
  0x26   : > { %246 = vrot.lane.b32.xlu0 %v245_v27, %s584_s6 }
  0x2a   : > { %254 = vrot.lane.b32.xlu0 %v253_v29, %s585_s7 }
  0x84   : > { %v231_v30 = vpop.permute.xlu1 %230 }
  0x88   : > { %v233_v31 = vpop.permute.xlu1 %232 }
  0x8c   : > { %v229_v32 = vpop.permute.xlu0 %228  ;;  %v237_v34 = vpop.permute.xlu1 %236 }
  0x8d   : > { %v264_v33 = vsel %vm260_vm4, %v484_v6, %v229_v32 }
  0x8e   : > { %v269_v36 = vsel %vm265_vm5, %v264_v33, %v233_v31 }
  0x8f   : > { %v272_v39 = vsel %vm270_vm6, %v269_v36, %v233_v31 }
  0x90   : > { %v227_v35 = vpop.permute.xlu0 %226  ;;  %v249_v41 = vpop.permute.xlu1 %248  ;;  %v277_v43 = vsel %vm273_vm7, %v272_v39, %v237_v34 }
  0x91   : > { %v262_v37 = vsel %vm260_vm4, %v636_v2, %v227_v35  ;;  %v282_v47 = vsel %vm278_vm8, %v277_v43, %v249_v41 }
  0x92   : > { %v267_v38 = vsel %vm265_vm5, %v262_v37, %v231_v30  ;;  %v285_v51 = vsel %vm283_vm9, %v282_v47, %v249_v41 }
  0x93   : > { %v271_v42 = vsel %vm270_vm6, %v267_v38, %v231_v30 }
  0x94   : > { %v235_v40 = vpop.permute.xlu0 %234  ;;  %v257_v48 = vpop.permute.xlu1 %256 }
  0x95   : > { %v275_v44 = vsel %vm273_vm7, %v271_v42, %v235_v40  ;;  %v290_v53 = vsel %vm286_vm10, %v285_v51, %v257_v48 }
  0x98   : > { %v247_v45 = vpop.permute.xlu0 %246 }
  0x99   : > { %v280_v46 = vsel %vm278_vm8, %v275_v44, %v247_v45 }
  0x9a   : > { %v284_v49 = vsel %vm283_vm9, %v280_v46, %v247_v45 }
  0x9c   : > { %v255_v50 = vpop.permute.xlu0 %254 }
  0x9d   : > { %v288_v52 = vsel %vm286_vm10, %v284_v49, %v255_v50 }
  0x9e   : > { %514 = vmatprep.mubr.msk.bf16.mxu0 %vm334_vm11, %v288_v52 }
  0x9f   : > { %515 = vmatmul.mubr.msk.bf16.vlgmr.msra.gmra.mrb[0].mxu0 %vm334_vm11, %v290_v53 }
 0x172   : > { %v516_v55 = vpop.f32.mrb[0].mxu0 }
 0x173   : > { %v386_v56 = vadd.f32 %v516_v55, %v486_v54  ;;  %v377_v57 = vpop.f32.mrb[1].mxu0 }
 0x174   : > { %v378_v58 = vadd.f32 %v486_v54, %v377_v57  ;;  %v517_v59 = vpop.f32.mrb[2].mxu0 }
 0x175   : > { %393 = vst.msk [vmem:[%s192_s17 + $0x10] sm:$0xff] %vm258_vm12, %v386_v56  ;;  %v380_v60 = vpop.f32.mrb[3].mxu0 }
 0x176   : > { %391 = vst.msk [vmem:[%s192_s17] sm:$0xff] %vm258_vm12, %v378_v58  ;;  %v381_v61 = vadd.f32 %v486_v54, %v380_v60 }
 0x178   : > { %392 = vst.msk [vmem:[%s192_s17 + $0x8] sm:$0xff] %vm258_vm12, %v381_v61 }
 0x179 PF: > { %s13_s14 = sadd.s32 1, %s579_s14   ;;  %s672_s12 = smov %s575_s13 }
 0x17a   : > { %p10_p5 = scmp.ge.s32.totalorder %s13_s14, 4   ;;  %s673_s13 = smov %s675_s15 }
 0x17c   :  { %12 = sbr.rel (!%p10_p5) target bundleno = 2 (0x2), region = 62 }

</bundles_post_ra>
